<compile_context>
chip_gen: v5e
topology: v5e:2x2
jax: 0.10.0
libtpu: 0.0.40
codegen_flags: <defaults>
</compile_context>

<pallas_src>
import jax
import jax.numpy as jnp
from jax.experimental import pallas as pl
from jax.experimental.pallas import tpu as pltpu


def _round_up(x, m):
    return (x + m - 1) // m * m


def _vmem_capacity_bytes():
    """Physical VMEM per TensorCore; conservative 64 MiB fallback (valid on all gens)."""
    try:
        info = pltpu.get_tpu_info()
        cap = getattr(info, "vmem_capacity_bytes", None)
        if cap:
            return int(cap)
    except Exception:
        pass
    return 64 << 20


def _tf_candidates(d_ff, max_tf=None):
    """Descending d_ff chunk sizes: full d_ff first (weight-stationary), then
    lane-aligned exact divisors (no weight padding needed)."""
    lane = 128
    cands = []
    if max_tf is None or d_ff <= max_tf:
        cands.append(d_ff)
    if d_ff % lane == 0:
        k = 2
        while d_ff // k >= lane:
            tf = d_ff // k
            if d_ff % k == 0 and tf % lane == 0 and (max_tf is None or tf <= max_tf):
                if tf not in cands:
                    cands.append(tf)
            k += 1
    if not cands:
        cands.append(d_ff)
    return cands


def _t5_layer_ff_kernel(eps):
    def kernel(x_ref, ln_ref, wi_ref, wo_ref, o_ref, acc_ref, norm_ref):
        f = pl.program_id(1)

        @pl.when(f == 0)
        def _init():
            x = x_ref[...].astype(jnp.float32)
            # T5LayerNorm: RMS norm (no mean subtraction, no bias), learned scale.
            var = jnp.mean(x * x, axis=-1, keepdims=True)
            g = ln_ref[...].astype(jnp.float32)           # (1, d_model) broadcasts over rows
            norm_ref[...] = (x * jax.lax.rsqrt(var + eps) * g).astype(norm_ref.dtype)
            acc_ref[...] = jnp.zeros_like(acc_ref)

        # DenseReluDense over one d_ff chunk: wi -> ReLU -> wo, f32 accumulation.
        h = jnp.dot(norm_ref[...], wi_ref[...], preferred_element_type=jnp.float32)
        h = jnp.maximum(h, 0.0).astype(wo_ref.dtype)
        acc_ref[...] += jnp.dot(h, wo_ref[...], preferred_element_type=jnp.float32)

        @pl.when(f == pl.num_programs(1) - 1)
        def _finalize():
            # residual add in f32; dropout = identity (eval mode).
            o_ref[...] = (x_ref[...].astype(jnp.float32) + acc_ref[...]).astype(o_ref.dtype)

    return kernel


def t5_layer_ff(hidden_states, ln_weight, wi_t, wo_t, *, eps=1e-6, tm=None, max_tf=None):
    """hidden_states: [B, S, d_model]; ln_weight: [d_model];
    wi_t: [d_model, d_ff]; wo_t: [d_ff, d_model] (pre-transposed, i.e. x @ W).
    Pass wi_t / wo_t in bf16 to run the matmuls at bf16 MXU rate (f32 accumulation)."""
    B, S, d_model = hidden_states.shape
    d_ff = wi_t.shape[1]
    out_dtype = hidden_states.dtype
    w_dtype = wi_t.dtype

    x_isz = jnp.dtype(hidden_states.dtype).itemsize
    out_isz = jnp.dtype(out_dtype).itemsize
    w_isz = jnp.dtype(w_dtype).itemsize

    # ---- chip-aware budgets ----
    vmem_cap = _vmem_capacity_bytes()
    budget = max(min(int(vmem_cap * 0.75), vmem_cap - (8 << 20)), 24 << 20)

    def vmem_need(tm_e, tf_e):
        return (2 * tm_e * d_model * x_isz            # x tile (double-buffered)
                + 2 * tm_e * d_model * out_isz        # output tile (double-buffered)
                + 4 * d_model * tf_e * w_isz          # wi + wo chunks (double-buffered)
                + tm_e * d_model * 4                  # f32 accumulator scratch
                + tm_e * d_model * w_isz              # normalized-x scratch
                + tm_e * tf_e * (4 + w_isz)           # first-matmul intermediate (f32 + cast)
                + 2 * d_model * 4)                    # ln weight

    # ---- token tiling (grid axis 0, "parallel") ----
    M = B * S
    row_mult = 8 if x_isz >= 4 else 16
    tm_req = tm if tm is not None else (768 if vmem_cap >= (100 << 20) else 512)
    # Keep grid[0] >= 2 when M allows (v7x has 2 TCs; only the parallel m axis is sharded).
    if M >= 2 * row_mult:
        split_cap = _round_up(-(-M // 2), row_mult)
    else:
        split_cap = _round_up(max(M, 1), row_mult)
    tm_eff = max(_round_up(min(tm_req, split_cap), row_mult), row_mult)

    # ---- d_ff tiling (grid axis 1, "arbitrary"): weight-stationary if it fits VMEM ----
    tf_cands = _tf_candidates(d_ff, max_tf)
    tm_e = tm_eff
    tf_pick = None
    while True:
        for tf_e in tf_cands:
            if vmem_need(tm_e, tf_e) <= budget:
                tf_pick = tf_e
                break
        if tf_pick is not None or tm_e <= row_mult:
            break
        tm_e = max(_round_up(tm_e // 2, row_mult), row_mult)
    if tf_pick is None:
        # last resort: smallest lane-aligned chunk (pads d_ff if it is not a 128-multiple)
        tf_pick = 128 if d_ff >= 128 else d_ff
    tm_eff, tf_eff = tm_e, tf_pick

    M_pad = _round_up(M, tm_eff)
    d_ff_pad = _round_up(d_ff, tf_eff)

    x2d = hidden_states.reshape(M, d_model)
    if M_pad != M:
        # zero rows: var=0 -> norm=0 -> output rows are 0 and sliced off below.
        x2d = jnp.pad(x2d, ((0, M_pad - M), (0, 0)))

    wi = wi_t
    wo = wo_t
    if d_ff_pad != d_ff:
        # TODO(synk): irregular d_ff — per-call zero pad here; hoist to load time in production.
        wi = jnp.pad(wi, ((0, 0), (0, d_ff_pad - d_ff)))
        wo = jnp.pad(wo, ((0, d_ff_pad - d_ff), (0, 0)))

    ln2d = ln_weight.reshape(1, d_model)

    grid = (M_pad // tm_eff, d_ff_pad // tf_eff)
    n_m, n_f = grid

    # ---- VMEM limit: clamp to physical capacity (v7x = 64 MiB), with headroom ----
    need = vmem_need(tm_eff, tf_eff)
    vmem_limit = int(min(vmem_cap, max(int(need * 1.3) + (4 << 20), 32 << 20)))

    # ---- cost estimate: account for weight re-streaming (or the one-shot read) ----
    weight_bytes = 2 * d_model * d_ff_pad * w_isz
    weight_passes = 1 if n_f == 1 else n_m
    cost = pl.CostEstimate(
        flops=int(4 * M * d_model * d_ff),           # two matmuls, 2*M*d_model*d_ff each
        transcendentals=int(M),                      # one rsqrt per token
        bytes_accessed=int(M * d_model * x_isz + M * d_model * out_isz
                           + weight_passes * weight_bytes + d_model * 4),
    )

    out2d = pl.pallas_call(
        _t5_layer_ff_kernel(eps),
        out_shape=jax.ShapeDtypeStruct((M_pad, d_model), out_dtype),
        grid_spec=pltpu.PrefetchScalarGridSpec(
            num_scalar_prefetch=0,
            grid=grid,
            in_specs=[
                pl.BlockSpec((tm_eff, d_model), lambda m, f: (m, 0)),   # token tile
                pl.BlockSpec((1, d_model), lambda m, f: (0, 0)),        # RMSNorm scale (resident)
                pl.BlockSpec((d_model, tf_eff), lambda m, f: (0, f)),   # wi chunk
                pl.BlockSpec((tf_eff, d_model), lambda m, f: (f, 0)),   # wo chunk
            ],
            out_specs=pl.BlockSpec((tm_eff, d_model), lambda m, f: (m, 0)),
            scratch_shapes=[
                pltpu.VMEM((tm_eff, d_model), jnp.float32),   # y accumulator
                pltpu.VMEM((tm_eff, d_model), w_dtype),       # normalized x
            ],
        ),
        compiler_params=pltpu.CompilerParams(
            dimension_semantics=("parallel", "arbitrary"),
            vmem_limit_bytes=vmem_limit,
        ),
        cost_estimate=cost,
    )(x2d, ln2d, wi, wo)

    return out2d[:M].reshape(B, S, d_model)


def reference_t5_layer_ff(hidden_states, ln_weight, wi_t, wo_t, eps=1e-6):
    x = hidden_states.astype(jnp.float32)
    var = jnp.mean(x * x, axis=-1, keepdims=True)
    norm = x * jax.lax.rsqrt(var + eps) * ln_weight.astype(jnp.float32)
    h = jnp.maximum(norm @ wi_t.astype(jnp.float32), 0.0)
    y = h @ wo_t.astype(jnp.float32)
    return (hidden_states.astype(jnp.float32) + y).astype(hidden_states.dtype)


if __name__ == "__main__":
    # TODO(synk): nn.Dropout has no in-kernel equivalent here; treated as identity (eval mode).
    key = jax.random.PRNGKey(0)

    # --- Check 1: small f32 config, weight-stationary path (tight tolerance) ---
    B, S, d_model, d_ff = 2, 8, 32, 64
    eps = 1e-6
    k_x, k_ln, k_wi, k_wo = jax.random.split(key, 4)
    hidden_states = jax.random.normal(k_x, (B, S, d_model), dtype=jnp.float32)
    ln_weight = 1.0 + 0.01 * jax.random.normal(k_ln, (d_model,), dtype=jnp.float32)
    wi_t = 0.05 * jax.random.normal(k_wi, (d_model, d_ff), dtype=jnp.float32)
    wo_t = 0.05 * jax.random.normal(k_wo, (d_ff, d_model), dtype=jnp.float32)

    out = jax.block_until_ready(t5_layer_ff(hidden_states, ln_weight, wi_t, wo_t, eps=eps))
    ref = reference_t5_layer_ff(hidden_states, ln_weight, wi_t, wo_t, eps=eps)
    assert out.shape == (B, S, d_model)
    assert jnp.allclose(out, ref, atol=1e-5, rtol=1e-5), "f32 mismatch vs reference"

    # --- Check 2: bf16 weights + ragged M + forced d_ff chunking (loose tolerance) ---
    B2, S2, d_model2, d_ff2 = 3, 5, 128, 256   # M=15 -> padded & split; max_tf=128 -> 2 d_ff chunks
    k_x2, k_ln2, k_wi2, k_wo2 = jax.random.split(jax.random.PRNGKey(1), 4)
    hs2 = jax.random.normal(k_x2, (B2, S2, d_model2), dtype=jnp.float32)
    ln2 = 1.0 + 0.01 * jax.random.normal(k_ln2, (d_model2,), dtype=jnp.float32)
    wi2 = 0.05 * jax.random.normal(k_wi2, (d_model2, d_ff2), dtype=jnp.float32)
    wo2 = 0.05 * jax.random.normal(k_wo2, (d_ff2, d_model2), dtype=jnp.float32)

    out2 = jax.block_until_ready(
        t5_layer_ff(hs2, ln2, wi2.astype(jnp.bfloat16), wo2.astype(jnp.bfloat16),
                    eps=eps, max_tf=128))
    ref2 = reference_t5_layer_ff(hs2, ln2, wi2, wo2, eps=eps)
    assert out2.shape == (B2, S2, d_model2)
    assert jnp.allclose(out2, ref2, atol=5e-2), "bf16 mismatch vs reference"

    print("KERNEL_OK")
</pallas_src>

<mosaic_0001>
module attributes {stable_mosaic.version = 11 : i64} {
  func.func @kernel(%arg0: i32, %arg1: i32, %arg2: memref<8x32xf32, #tpu.memory_space<vmem>>, %arg3: memref<1x32xf32, #tpu.memory_space<vmem>>, %arg4: memref<32x64xf32, #tpu.memory_space<vmem>>, %arg5: memref<64x32xf32, #tpu.memory_space<vmem>>, %arg6: memref<8x32xf32, #tpu.memory_space<vmem>>, %arg7: memref<8x32xf32, #tpu.memory_space<vmem>>, %arg8: memref<8x32xf32, #tpu.memory_space<vmem>>) attributes {dimension_semantics = [#tpu.dimension_semantics<parallel>, #tpu.dimension_semantics<arbitrary>], iteration_bounds = array<i64: 2, 1>, scalar_prefetch = 0 : i64, scratch_operands = 2 : i64, tpu.core_type = #tpu.core_type<tc>, window_params = [{transform_indices = @transform_0, window_bounds = array<i64: 8, 32>}, {pipeline_mode = #tpu.pipeline_mode<synchronous>, transform_indices = @transform_1, window_bounds = array<i64: 1, 32>}, {transform_indices = @transform_2, window_bounds = array<i64: 32, 64>}, {transform_indices = @transform_3, window_bounds = array<i64: 64, 32>}, {transform_indices = @transform_4, window_bounds = array<i64: 8, 32>}]} {
    %c0_i32 = arith.constant 0 : i32
    %0 = arith.cmpi eq, %arg1, %c0_i32 : i32
    %1 = arith.extui %0 : i1 to i32
    %c0_i32_0 = arith.constant 0 : i32
    %2 = arith.cmpi ne, %1, %c0_i32_0 : i32
    scf.if %2 {
      %c0_14 = arith.constant 0 : index
      %c0_15 = arith.constant 0 : index
      %16 = vector.load %arg2[%c0_14, %c0_15] : memref<8x32xf32, #tpu.memory_space<vmem>>, vector<8x32xf32>
      %17 = arith.mulf %16, %16 : vector<8x32xf32>
      %cst_16 = arith.constant dense<0.000000e+00> : vector<8xf32>
      %18 = vector.multi_reduction <add>, %17, %cst_16 [1] : vector<8x32xf32> to vector<8xf32>
      %19 = vector.shape_cast %18 : vector<8xf32> to vector<8x1xf32>
      %cst_17 = arith.constant 3.200000e+01 : f32
      %20 = vector.broadcast %cst_17 : f32 to vector<8x1xf32>
      %21 = arith.divf %19, %20 : vector<8x1xf32>
      %c0_18 = arith.constant 0 : index
      %c0_19 = arith.constant 0 : index
      %22 = vector.load %arg3[%c0_18, %c0_19] : memref<1x32xf32, #tpu.memory_space<vmem>>, vector<1x32xf32>
      %cst_20 = arith.constant 9.99999997E-7 : f32
      %23 = vector.broadcast %cst_20 : f32 to vector<8x1xf32>
      %24 = arith.addf %21, %23 : vector<8x1xf32>
      %25 = math.rsqrt %24 : vector<8x1xf32>
      %26 = vector.broadcast %25 : vector<8x1xf32> to vector<8x32xf32>
      %27 = arith.mulf %16, %26 : vector<8x32xf32>
      %28 = vector.broadcast %22 : vector<1x32xf32> to vector<8x32xf32>
      %29 = arith.mulf %27, %28 : vector<8x32xf32>
      %c0_21 = arith.constant 0 : index
      %c0_22 = arith.constant 0 : index
      %30 = vector.load %arg8[%c0_21, %c0_22] : memref<8x32xf32, #tpu.memory_space<vmem>>, vector<8x32xf32>
      tpu.vector_store %arg8[%c0_21, %c0_22], %29 {strides = array<i32>} : memref<8x32xf32, #tpu.memory_space<vmem>>, vector<8x32xf32>,
      %cst_23 = arith.constant 0.000000e+00 : f32
      %31 = vector.broadcast %cst_23 : f32 to vector<8x32xf32>
      %c0_24 = arith.constant 0 : index
      %c0_25 = arith.constant 0 : index
      %32 = vector.load %arg7[%c0_24, %c0_25] : memref<8x32xf32, #tpu.memory_space<vmem>>, vector<8x32xf32>
      tpu.vector_store %arg7[%c0_24, %c0_25], %31 {strides = array<i32>} : memref<8x32xf32, #tpu.memory_space<vmem>>, vector<8x32xf32>,
    } else {
    }
    %c0 = arith.constant 0 : index
    %c0_1 = arith.constant 0 : index
    %3 = vector.load %arg8[%c0, %c0_1] : memref<8x32xf32, #tpu.memory_space<vmem>>, vector<8x32xf32>
    %c0_2 = arith.constant 0 : index
    %c0_3 = arith.constant 0 : index
    %4 = vector.load %arg4[%c0_2, %c0_3] : memref<32x64xf32, #tpu.memory_space<vmem>>, vector<32x64xf32>
    %cst = arith.constant dense<0.000000e+00> : vector<8x64xf32>
    %5 = tpu.matmul %3, %4, %cst {dimension_numbers = #tpu.dot_dimension_numbers<[1], [0], [0], [1], [0, 0, 1, 1], [], []>} : vector<8x32xf32>, vector<32x64xf32>, vector<8x64xf32> -> vector<8x64xf32>
    %cst_4 = arith.constant 0.000000e+00 : f32
    %6 = vector.broadcast %cst_4 : f32 to vector<8x64xf32>
    %7 = arith.maximumf %5, %6 : vector<8x64xf32>
    %c0_5 = arith.constant 0 : index
    %c0_6 = arith.constant 0 : index
    %8 = vector.load %arg7[%c0_5, %c0_6] : memref<8x32xf32, #tpu.memory_space<vmem>>, vector<8x32xf32>
    %c0_7 = arith.constant 0 : index
    %c0_8 = arith.constant 0 : index
    %9 = vector.load %arg5[%c0_7, %c0_8] : memref<64x32xf32, #tpu.memory_space<vmem>>, vector<64x32xf32>
    %cst_9 = arith.constant dense<0.000000e+00> : vector<8x32xf32>
    %10 = tpu.matmul %7, %9, %cst_9 {dimension_numbers = #tpu.dot_dimension_numbers<[1], [0], [0], [1], [0, 0, 1, 1], [], []>} : vector<8x64xf32>, vector<64x32xf32>, vector<8x32xf32> -> vector<8x32xf32>
    %11 = arith.addf %8, %10 : vector<8x32xf32>
    %c0_10 = arith.constant 0 : index
    %c0_11 = arith.constant 0 : index
    %12 = vector.load %arg7[%c0_10, %c0_11] : memref<8x32xf32, #tpu.memory_space<vmem>>, vector<8x32xf32>
    tpu.vector_store %arg7[%c0_10, %c0_11], %11 {strides = array<i32>} : memref<8x32xf32, #tpu.memory_space<vmem>>, vector<8x32xf32>,
    %c0_i32_12 = arith.constant 0 : i32
    %13 = arith.cmpi eq, %arg1, %c0_i32_12 : i32
    %14 = arith.extui %13 : i1 to i32
    %c0_i32_13 = arith.constant 0 : i32
    %15 = arith.cmpi ne, %14, %c0_i32_13 : i32
    scf.if %15 {
      %c0_14 = arith.constant 0 : index
      %c0_15 = arith.constant 0 : index
      %16 = vector.load %arg2[%c0_14, %c0_15] : memref<8x32xf32, #tpu.memory_space<vmem>>, vector<8x32xf32>
      %c0_16 = arith.constant 0 : index
      %c0_17 = arith.constant 0 : index
      %17 = vector.load %arg7[%c0_16, %c0_17] : memref<8x32xf32, #tpu.memory_space<vmem>>, vector<8x32xf32>
      %18 = arith.addf %16, %17 : vector<8x32xf32>
      %c0_18 = arith.constant 0 : index
      %c0_19 = arith.constant 0 : index
      %19 = vector.load %arg6[%c0_18, %c0_19] : memref<8x32xf32, #tpu.memory_space<vmem>>, vector<8x32xf32>
      tpu.vector_store %arg6[%c0_18, %c0_19], %18 {strides = array<i32>} : memref<8x32xf32, #tpu.memory_space<vmem>>, vector<8x32xf32>,
    } else {
    }
    return
  }
  func.func @transform_0(%arg0: i32, %arg1: i32) -> (i32, i32) {
    %c0_i32 = arith.constant 0 : i32
    %c0_i32_0 = arith.constant 0 : i32
    return %arg0, %c0_i32 : i32, i32
  }
  func.func @transform_1(%arg0: i32, %arg1: i32) -> (i32, i32) {
    %c0_i32 = arith.constant 0 : i32
    %c0_i32_0 = arith.constant 0 : i32
    %c0_i32_1 = arith.constant 0 : i32
    return %c0_i32, %c0_i32_0 : i32, i32
  }
  func.func @transform_2(%arg0: i32, %arg1: i32) -> (i32, i32) {
    %c0_i32 = arith.constant 0 : i32
    %c0_i32_0 = arith.constant 0 : i32
    return %c0_i32, %arg1 : i32, i32
  }
  func.func @transform_3(%arg0: i32, %arg1: i32) -> (i32, i32) {
    %c0_i32 = arith.constant 0 : i32
    %c0_i32_0 = arith.constant 0 : i32
    return %arg1, %c0_i32 : i32, i32
  }
  func.func @transform_4(%arg0: i32, %arg1: i32) -> (i32, i32) {
    %c0_i32 = arith.constant 0 : i32
    %c0_i32_0 = arith.constant 0 : i32
    return %arg0, %c0_i32 : i32, i32
  }
}

</mosaic_0001>

<bundles_post_ra>
// kernel: tpu_custom_call.1
= control target key start
LH: loop header
LB: loop body
LE: loop exit
PB: predicated region body
PF: predicated region fallthrough
CT: control target
= control target key end

     0   :  { %9 = vsyncpa [#allocation5], 0  ;;  %s798_s0 = inlined_call_operand.vmem [shape: f32[16,32], index: 0, kind: input, shape index: {}]   ;;  %s799_s1 = inlined_call_operand.vmem [shape: f32[1,32], index: 1, kind: input, shape index: {}]   ;;  %s800_s2 = inlined_call_operand.vmem [shape: f32[32,64], index: 2, kind: input, shape index: {}]   ;;  %s801_s3 = inlined_call_operand.vmem [shape: f32[64,32], index: 3, kind: input, shape index: {}]   ;;  %s802_s4 = inlined_call_operand.hbm [shape: f32[16,32], index: 4, kind: output, shape index: {}]  }
   0x1   :  { %11 = vsyncpa [#allocation5 + $0x1], 0  ;;  %s650_s15 = smov 0   ;;  %s652_s16 = smov 0  }
   0x2   :  { %s654_s17 = smov 0   ;;  %s656_s18 = smov 0  }
   0x3   :  { %s658_s19 = smov 0   ;;  %s660_s20 = smov 0  }
   0x4 LB: > { %s466_s21 = sadd.s32 4294967295, %s621_s20   ;;  %s467_s22 = sadd.s32 4294967294, %s621_s20   ;;  %s621_s20 = sphi %s660_s20, %s17_s20   ;;  %s617_s19 = sphi %s658_s19, %s809_s19   ;;  %s613_s18 = sphi %s656_s18, %s808_s18   ;;  %s609_s17 = sphi %s654_s17, %s807_s17   ;;  %s605_s16 = sphi %s652_s16, %s806_s16   ;;  %s601_s15 = sphi %s650_s15, %s805_s15  }
   0x5   : > { %s29_s23 = sadd.s32 1, %s617_s19  ;;  %s135_s24 = sadd.s32 1, %s609_s17 }
   0x6   : > { %p31_p0 = scmp.ge.s32.totalorder %s29_s23, 2  ;;  %p145_p1 = scmp.ne.s32.totalorder %s609_s17, %s605_s16 }
   0x7   : > { %p146_p2 = scmp.eq.s32.totalorder %s466_s21, 1  ;;  %p151_p3 = scmp.ne.s32.totalorder %s605_s16, %s601_s15 }
   0x8   : > { %s811_s23 = smov (%p31_p0, %s29_s23), 0  ;;  %p152_p5 = scmp.eq.s32.totalorder %s467_s22, 1 }
   0x9   : > { %p690_p4 = por %p146_p2, %p145_p1  ;;  %s132_s26 = ssub.s32 %s617_s19, %s811_s23 }
   0xa   : > { %p472_p6 = scmp.ge.s32.totalorder %s621_s20, 1  ;;  %p133_p7 = scmp.eq.s32.totalorder %s132_s26, 0 }
   0xb   : > { %p697_p8 = por %p152_p5, %p151_p3  ;;  %p196_p9 = scmp.lt.s32.totalorder %s621_s20, 3 }
   0xc   : > { %s703_s28 = scalar_select %p133_p7, %s609_s17, %s135_s24  }
   0xd   : > { %p197_p10 = pnand %p472_p6, %p196_p9 }
   0xe   : > { %p230_p11 = scmp.lt.s32.totalorder (!%p197_p10), %s613_s18, 1  ;;  %s227_s26 = sand.u32 (!%p197_p10), 1, %s605_s16  }
   0xf   : > { %200 = sbr.rel (%p197_p10) target bundleno = 447 (0x1bf), region = 36  ;;  %s354_s11 = scalar_lea.sflag (!%p197_p10), [#allocation5], %s227_s26 }
  0x10   : > { %s563_s21 = scalar_lea.hbm (!%p197_p10), %s802_s4, 16 }
  0x14   : > { %s231_s29 = scalar_select %p230_p11, %s613_s18, 1  ;;  %vm250_vm0 = vcmask 261120   ;;  %v623_v3 = vmov 32.0   ;;  %v285_v9 = vld [vmem:[%s800_s2 + $0x18] sm:$0xff]  ;;  %v284_v10 = vld [vmem:[%s800_s2 + $0x10] sm:$0xff]  ;;  %v283_v11 = vld [vmem:[%s800_s2 + $0x8] sm:$0xff] }
  0x15   : > { %539 = vrcp.f32 %v623_v3  ;;  %302 = vmatpush.msra.mxu0 %v285_v9  ;;  %v282_v13 = vld [vmem:[%s800_s2] sm:$0xff]  ;;  %v319_v17 = vld [vmem:[%s801_s3 + $0x38] sm:$0xff]  ;;  %v318_v18 = vld [vmem:[%s801_s3 + $0x30] sm:$0xff]  ;;  %v624_v36 = vmov 0.0   ;;  %vm320_vm5 = vcmask 523264  }
  0x16   : > { %s474_s30 = sshll.u32 %s231_s29, 3  ;;  %332 = vmatpush.msra.mxu1 %v319_v17  ;;  %v317_v19 = vld [vmem:[%s801_s3 + $0x28] sm:$0xff]  ;;  %v316_v20 = vld [vmem:[%s801_s3 + $0x20] sm:$0xff]  ;;  %v315_v21 = vld [vmem:[%s801_s3 + $0x18] sm:$0xff]  ;;  %280 = vst.msk [vmem:[#allocation2] sm:$0xff] %vm250_vm0, %v624_v36  ;;  %s473_s29 = sshll.u32 %s227_s26, 3 }
  0x17   : > { %s233_s7 = scalar_lea.vmem %s798_s0, %s474_s30  ;;  %303 = vmatpush.msra.mxu0 %v284_v10  ;;  %v314_v23 = vld [vmem:[%s801_s3 + $0x10] sm:$0xff]  ;;  %v538_v29 = vld [vmem:[%s799_s1] ss:$0 sm:$0xff]  ;;  %v313_v34 = vld [vmem:[%s801_s3 + $0x8] sm:$0xff]  ;;  %s478_s30 = sshll.u32 %s613_s18, 3 }
  0x18   : > { %v710_v0 = vld [vmem:[%s233_s7] sm:$0xff]  ;;  %333 = vmatpush.msra.mxu1 %v318_v18  ;;  %s364_s7 = scalar_lea.hbm %s802_s4, %s478_s30  ;;  %s229_s8 = scalar_lea.vmem [#allocation4], %s473_s29 }
  0x19   : > { %v249_v1 = vmul.f32 %v710_v0, %v710_v0  ;;  %304 = vmatpush.msra.mxu0 %v283_v11  ;;  %v312_v35 = vld [vmem:[%s801_s3] sm:$0xff]  ;;  %s366_s9 = sshll.u32 %s229_s8, 4  ;;  %s368_s10 = sshll.u32 %s364_s7, 4  ;;  %s367_s9 = int_to_ptr.vmem [resolvable:$true] %s366_s9  ;;  %s369_s10 = int_to_ptr.hbm [resolvable:$true] %s368_s10 }
  0x1a   : > { %334 = vmatpush.msra.mxu1 %v317_v19  ;;  %s557_s12 = sshra.s32 %s369_s10, 4  ;;  %s558_s12 = int_to_ptr.hbm [resolvable:$true] %s557_s12 }
  0x1b   : > { %v251_v2 = vsel %vm250_vm0, %v249_v1, 0.0  ;;  %v540_v4 = vpop.eup %539  ;;  %305 = vmatpush.msra.mxu0 %v282_v13  ;;  %s559_s18 = scalar_lea.hbm %s558_s12, 8  ;;  %p564_p1 = scmp.lt.s32.totalorder %s558_s12, %s802_s4 }
  0x1c   : > { %252 = vadd.xlane.f32.xlu0 %v251_v2  ;;  %v255_v5 = vmul.f32 32.0, %v540_v4  ;;  %vm259_vm1 = vweird.f32 %v540_v4  ;;  %335 = vmatpush.msra.mxu1 %v316_v20  ;;  %p560_p12 = scmp.ne.s32.totalorder %s558_s12, %s559_s18  ;;  %p565_p2 = scmp.lt.s32.totalorder %s563_s21, %s559_s18 }
  0x1d   : > { %v311_v39 = vld [vmem:[#allocation2] sm:$0xff] }
  0x1e   : > { %v256_v6 = vsub.f32 1.0, %v255_v5  ;;  %336 = vmatpush.msra.mxu1 %v315_v21  ;;  %p561_p13 = pnand %p560_p12, %p690_p4  ;;  %p566_p3 = por %p565_p2, %p564_p1 }
  0x20   : > { %v257_v7 = vmul.f32 %v540_v4, %v256_v6  ;;  %337 = vmatpush.msra.mxu1 %v314_v23  ;;  %p562_p0 = pneg %p561_p13 }
  0x22   : > { %v258_v8 = vadd.f32 %v540_v4, %v257_v7  ;;  %338 = vmatpush.msra.mxu1 %v313_v34  ;;  %p567_p5 = pnand %p566_p3, %p562_p0 }
  0x24   : > { %v260_v12 = vsel %vm259_vm1, %v540_v4, %v258_v8  ;;  %339 = vmatpush.msra.mxu1 %v312_v35 }
  0x8f   : > { %v253_v14 = vpop.xlane.xlu0 %252 }
  0x90   : > { %v261_v15 = vmul.f32 %v260_v12, %v253_v14 }
  0x92   : > { %v263_v16 = vadd.f32 1e-06, %v261_v15 }
  0x94   : > { %541 = vrsqrt.f32 %v263_v16  ;;  %vm270_vm3 = vweird.f32 %v263_v16 }
  0x9a   : > { %v542_v22 = vpop.eup %541 }
  0x9b   : > { %v265_v24 = vmul.f32 %v542_v22, %v263_v16  ;;  %vm271_vm2 = vweird.f32 %v542_v22 }
  0x9c   : > { %vm272_vm4 = vmor %vm270_vm3, %vm271_vm2 }
  0x9d   : > { %v266_v25 = vmul.f32 %v542_v22, %v265_v24 }
  0x9f   : > { %v267_v26 = vmul.f32 0.5, %v266_v25 }
  0xa1   : > { %v268_v27 = vsub.f32 1.5, %v267_v26 }
  0xa3   : > { %v269_v28 = vmul.f32 %v542_v22, %v268_v27 }
  0xa5   : > { %v273_v30 = vsel %vm272_vm4, %v542_v22, %v269_v28 }
  0xa6   : > { %v274_v31 = vmul.f32 %v273_v30, %v710_v0 }
  0xa8   : > { %v278_v32 = vmul.f32 %v538_v29, %v274_v31 }
  0xaa   : > { %279 = vst.msk [vmem:[#allocation3] sm:$0xff] %vm250_vm0, %v278_v32 }
  0xb1   : > { %v281_v33 = vld [vmem:[#allocation3] sm:$0xff] }
  0xb2   : > { %475 = vmatmul.msk.f32.vlgmr.msra.gmra.mxu0 %vm250_vm0, %v281_v33 }
 0x12f   : > { %v307_v37 = vpop.f32.mrf.mxu0 }
 0x130   : > { %v310_v38 = vmax.f32 %v307_v37, 0.0 }
 0x132   : > { %476 = vmatmul.msk.f32.vlgmr.msra.gmra.mxu1 %vm320_vm5, %v310_v38 }
 0x1af   : > { %v341_v40 = vpop.f32.mrf.mxu1 }
 0x1b0   : > { %v344_v41 = vadd.f32 %v341_v40, %v311_v39 }
 0x1b2   : > { %345 = vst.msk [vmem:[#allocation2] sm:$0xff] %vm250_vm0, %v344_v41 }
 0x1b9   : > { %v350_v42 = vld [vmem:[#allocation2] sm:$0xff] }
 0x1ba   : > { %v351_v43 = vadd.f32 %v350_v42, %v710_v0 }
 0x1bc   : > { %352 = vst.msk [vmem:[%s229_s8] sm:$0xff] %vm250_vm0, %v351_v43 }
 0x1bd   : > { %570 = shalt.err (!%p567_p5)
}
 0x1be   : > { %481 = dma.vmem_to_hbm [thread:$0]  (%p690_p4), %s367_s9, 128, %s369_s10, %s354_s11  }
 0x1bf PF: > { %p487_p6 = scmp.ge.s32.totalorder %s621_s20, 2  ;;  %s380_s26 = sand.u32 1, %s601_s15  }
 0x1c0   : > { %s381_s29 = scalar_lea.sflag [#allocation5], %s380_s26 }
 0x1c1   : > { %p484_p7 = pnand %p487_p6, %p697_p8 }
 0x1c3   : > { %p485_p9 = pneg %p484_p7 }
 0x1c5   : > { %596 = dma.done.wait (%p485_p9), %s381_s29, 128  }
 0x1c6   : > { %598 = vsyncadd (%p485_p9), %s381_s29, 4294967168  ;;  %s17_s20 = sadd.s32 1, %s621_s20   ;;  %s805_s15 = smov %s605_s16 }
 0x1c7   : > { %p14_p10 = scmp.ge.s32.totalorder %s17_s20, 4   ;;  %s806_s16 = smov %s609_s17 }
 0x1c8   : > { %s807_s17 = smov %s703_s28  ;;  %s808_s18 = smov %s617_s19 }
 0x1c9   : > { %s809_s19 = smov %s811_s23  ;;  %16 = sbr.rel (!%p14_p10) target bundleno = 4 (0x4), region = 85 }
 0x1ce   :  { %387 = vsyncpa [#allocation5], 1 }
 0x1cf   :  { %389 = vsyncpa [#allocation5 + $0x1], 1 }

</bundles_post_ra>
